<compile_context>
chip_gen: v7x
topology: tpu7x:2x2x1
jax: 0.10.0
libtpu: 0.0.40
codegen_flags: <defaults>
</compile_context>

<pallas_src>
import jax
import jax.numpy as jnp
from jax.experimental import pallas as pl
from jax.experimental.pallas import tpu as pltpu

_LANE = 128
_SUBLANE = 8


def _round_up(x, m):
    return ((x + m - 1) // m) * m


def _vmem_budget_bytes():
    """Per-core VMEM budget with headroom for compiler scratch / pipelining."""
    try:
        cap = int(pltpu.get_tpu_info().vmem_capacity_bytes)
    except Exception:
        cap = 64 * 1024 * 1024  # conservative fallback (v7x per-core size)
    return max(16 * 1024 * 1024, min(int(cap * 0.82), cap - 4 * 1024 * 1024))


# ---------------------------------------------------------------------------
# Parameter preparation (done once, outside the per-call path)
# ---------------------------------------------------------------------------
def prepare_ffn_params(w1, b1, w2, b2, compute_dtype=jnp.bfloat16):
    """Transpose torch-layout weights, cast to bf16, pad E/H to 128 multiples.

    w1: (H, E), b1: (H,), w2: (E, H), b2: (E,)   (torch nn.Linear layout,
    H = 4*E).  Zero padding is numerically inert (padded x columns are zero,
    padded hidden units produce ReLU(0) == 0).
    """
    H, E = w1.shape
    E_pad = _round_up(E, _LANE)
    H_pad = _round_up(H, _LANE)
    w1_t = jnp.pad(jnp.transpose(w1), ((0, E_pad - E), (0, H_pad - H)))
    w2_t = jnp.pad(jnp.transpose(w2), ((0, H_pad - H), (0, E_pad - E)))
    b1_2 = jnp.pad(b1.reshape(1, H), ((0, 0), (0, H_pad - H)))
    b2_2 = jnp.pad(b2.reshape(1, E), ((0, 0), (0, E_pad - E)))
    return (w1_t.astype(compute_dtype), b1_2.astype(jnp.float32),
            w2_t.astype(compute_dtype), b2_2.astype(jnp.float32))


# ---------------------------------------------------------------------------
# Kernels
# ---------------------------------------------------------------------------
def _ffn_resident_kernel(x_ref, w1_ref, b1_ref, w2_ref, b2_ref, o_ref):
    # Whole hidden dim in one shot; weights stay resident across the grid.
    h = jnp.dot(x_ref[...], w1_ref[...],
                preferred_element_type=jnp.float32) + b1_ref[...]
    h = jnp.maximum(h, 0.0)                                     # ReLU (f32)
    y = jnp.dot(h.astype(w2_ref.dtype), w2_ref[...],
                preferred_element_type=jnp.float32) + b2_ref[...]
    o_ref[...] = y.astype(o_ref.dtype)                          # dropout == id


def _ffn_stream_f32out_kernel(x_ref, w1_ref, b1_ref, w2_ref, b2_ref, o_ref):
    # Hidden axis tiled; f32 output block is resident across j -> accumulate
    # directly into it (no scratch, no epilogue copy).
    j = pl.program_id(1)

    @pl.when(j == 0)
    def _():
        o_ref[...] = jnp.zeros_like(o_ref) + b2_ref[...]

    h = jnp.dot(x_ref[...], w1_ref[...],
                preferred_element_type=jnp.float32) + b1_ref[...]
    h = jnp.maximum(h, 0.0)
    o_ref[...] += jnp.dot(h.astype(w2_ref.dtype), w2_ref[...],
                          preferred_element_type=jnp.float32)


def _ffn_stream_acc_kernel(x_ref, w1_ref, b1_ref, w2_ref, b2_ref, o_ref,
                           acc_ref):
    # Hidden axis tiled; accumulate into an f32 scratch, cast once at the end.
    j = pl.program_id(1)

    @pl.when(j == 0)
    def _():
        acc_ref[...] = jnp.zeros_like(acc_ref)

    h = jnp.dot(x_ref[...], w1_ref[...],
                preferred_element_type=jnp.float32) + b1_ref[...]
    h = jnp.maximum(h, 0.0)
    acc_ref[...] += jnp.dot(h.astype(w2_ref.dtype), w2_ref[...],
                            preferred_element_type=jnp.float32)

    @pl.when(j == pl.num_programs(1) - 1)
    def _():
        o_ref[...] = (acc_ref[...] + b2_ref[...]).astype(o_ref.dtype)


# ---------------------------------------------------------------------------
# Tile / path selection (pure shape + hardware function; runs at trace time)
# ---------------------------------------------------------------------------
def _fit_tm(M8, tm_cap, target):
    tm_cap = int(tm_cap)
    if tm_cap < _SUBLANE:
        return None
    tm = min(target, tm_cap, M8)
    tm = max(_SUBLANE, (tm // _SUBLANE) * _SUBLANE)
    # Megacore: keep >= 2 row tiles so the second TensorCore (v7x) has work.
    if tm >= M8 and M8 >= 2 * _SUBLANE:
        tm = _round_up(M8 // 2, _SUBLANE)
    return tm


def _choose_config(M, E_pad, H_pad, out_itemsize, budget):
    M8 = _round_up(max(M, 1), _SUBLANE)

    def per_row_bytes(th, need_acc):
        b = 2 * E_pad * 2                    # x tile (bf16), double-buffered
        b += 2 * E_pad * out_itemsize        # out tile, double-buffered
        if need_acc:
            b += E_pad * 4                   # f32 accumulator scratch
        b += th * (4 + 2)                    # hidden intermediate (f32 + bf16)
        return b

    def weight_bytes(th):
        # double-buffered bf16 W1^T / W2^T chunks + biases
        return 2 * (2 * E_pad * th + 2 * th * E_pad) + 2 * 4 * (th + E_pad)

    # --- Resident path: whole W1^T / W2^T held in VMEM for the entire grid.
    res_wb = weight_bytes(H_pad)
    if res_wb <= 0.7 * budget:
        tm_cap = (budget - res_wb) // per_row_bytes(H_pad, False)
        tm = _fit_tm(M8, tm_cap, target=512)
        if tm is not None:
            return {"resident": True, "tm": tm, "th": H_pad}

    # --- Streaming path: per-generation row-tile target; when VMEM is tight
    #     shrink th before shrinking tm.
    target_tm = 1024 if budget >= 100 * 1024 * 1024 else 512
    desired_tm = _fit_tm(M8, 1 << 40, target_tm)
    need_acc = out_itemsize != 4
    th_candidates = [t for t in (2048, 1024, 512, 256, 128)
                     if t <= H_pad and H_pad % t == 0]
    best = None
    for th in th_candidates:
        rem = budget - weight_bytes(th)
        if rem <= 0:
            continue
        tm = _fit_tm(M8, rem // per_row_bytes(th, need_acc), target_tm)
        if tm is None:
            continue
        if best is None or tm > best[0]:
            best = (tm, th)
        if desired_tm is not None and tm >= desired_tm:
            break
    if best is None:
        best = (_SUBLANE, 128)               # last resort
    return {"resident": False, "tm": best[0], "th": best[1]}


# ---------------------------------------------------------------------------
# Wrapper
# ---------------------------------------------------------------------------
@jax.jit
def feed_forward(x, w1_t, b1_2, w2_t, b2_2):
    """x: (..., E). Weights prepared by prepare_ffn_params (padded, bf16)."""
    orig_shape = x.shape
    E = orig_shape[-1]
    E_pad, H_pad = w1_t.shape
    M = 1
    for d in orig_shape[:-1]:
        M *= d
    out_dtype = x.dtype
    out_itemsize = jnp.dtype(out_dtype).itemsize

    # Hoisted one-time bf16 cast of the activations (halves LHS bytes/VMEM).
    x2 = x.reshape(M, E).astype(w1_t.dtype)
    if E_pad != E:
        x2 = jnp.pad(x2, ((0, 0), (0, E_pad - E)))

    budget = _vmem_budget_bytes()
    cfg = _choose_config(M, E_pad, H_pad, out_itemsize, budget)
    tm, th = cfg["tm"], cfg["th"]

    M_pad = _round_up(max(M, 1), tm)
    if M_pad != M:
        x2 = jnp.pad(x2, ((0, M_pad - M), (0, 0)))
    n_m = M_pad // tm

    weight_stream_factor = 1 if cfg["resident"] else n_m
    cost = pl.CostEstimate(
        flops=4 * M_pad * E_pad * H_pad,
        transcendentals=0,
        bytes_accessed=(M_pad * E_pad * 2                       # x in (bf16)
                        + M_pad * E_pad * out_itemsize          # out
                        + weight_stream_factor * 4 * E_pad * H_pad  # W1^T,W2^T
                        + 4 * (H_pad + E_pad)),                 # biases
    )

    if cfg["resident"]:
        out = pl.pallas_call(
            _ffn_resident_kernel,
            out_shape=jax.ShapeDtypeStruct((M_pad, E_pad), out_dtype),
            grid_spec=pltpu.PrefetchScalarGridSpec(
                num_scalar_prefetch=0,
                grid=(n_m,),
                in_specs=[
                    pl.BlockSpec((tm, E_pad), lambda i: (i, 0)),    # x rows
                    pl.BlockSpec((E_pad, H_pad), lambda i: (0, 0)),  # W1^T
                    pl.BlockSpec((1, H_pad), lambda i: (0, 0)),      # b1
                    pl.BlockSpec((H_pad, E_pad), lambda i: (0, 0)),  # W2^T
                    pl.BlockSpec((1, E_pad), lambda i: (0, 0)),      # b2
                ],
                out_specs=pl.BlockSpec((tm, E_pad), lambda i: (i, 0)),
            ),
            compiler_params=pltpu.CompilerParams(
                dimension_semantics=("parallel",),
                vmem_limit_bytes=int(budget)),
            cost_estimate=cost,
        )(x2, w1_t, b1_2, w2_t, b2_2)
    else:
        in_specs = [
            pl.BlockSpec((tm, E_pad), lambda i, j: (i, 0)),     # x row tile
            pl.BlockSpec((E_pad, th), lambda i, j: (0, j)),     # W1^T chunk
            pl.BlockSpec((1, th), lambda i, j: (0, j)),         # b1 chunk
            pl.BlockSpec((th, E_pad), lambda i, j: (j, 0)),     # W2^T chunk
            pl.BlockSpec((1, E_pad), lambda i, j: (0, 0)),      # b2
        ]
        out_spec = pl.BlockSpec((tm, E_pad), lambda i, j: (i, 0))
        if out_itemsize == 4 and jnp.issubdtype(out_dtype, jnp.floating):
            kernel, scratch = _ffn_stream_f32out_kernel, []
        else:
            kernel = _ffn_stream_acc_kernel
            scratch = [pltpu.VMEM((tm, E_pad), jnp.float32)]
        out = pl.pallas_call(
            kernel,
            out_shape=jax.ShapeDtypeStruct((M_pad, E_pad), out_dtype),
            grid_spec=pltpu.PrefetchScalarGridSpec(
                num_scalar_prefetch=0,
                grid=(n_m, H_pad // th),
                in_specs=in_specs,
                out_specs=out_spec,
                scratch_shapes=scratch,
            ),
            compiler_params=pltpu.CompilerParams(
                dimension_semantics=("parallel", "arbitrary"),
                vmem_limit_bytes=int(budget)),
            cost_estimate=cost,
        )(x2, w1_t, b1_2, w2_t, b2_2)

    return out[:M, :E].reshape(orig_shape)


# ---------------------------------------------------------------------------
# Self-test
# ---------------------------------------------------------------------------
if __name__ == "__main__":
    B, T, E = 2, 8, 32
    H = 4 * E
    key = jax.random.PRNGKey(0)
    kx, k1, k2, k3, k4 = jax.random.split(key, 5)

    x = jax.random.normal(kx, (B, T, E), dtype=jnp.float32)
    bound1 = 1.0 / (E ** 0.5)
    bound2 = 1.0 / (H ** 0.5)
    w1 = jax.random.uniform(k1, (H, E), minval=-bound1, maxval=bound1,
                            dtype=jnp.float32)
    b1 = jax.random.uniform(k2, (H,), minval=-bound1, maxval=bound1,
                            dtype=jnp.float32)
    w2 = jax.random.uniform(k3, (E, H), minval=-bound2, maxval=bound2,
                            dtype=jnp.float32)
    b2 = jax.random.uniform(k4, (E,), minval=-bound2, maxval=bound2,
                            dtype=jnp.float32)

    params = prepare_ffn_params(w1, b1, w2, b2)   # one-time prep
    out = feed_forward(x, *params)
    jax.block_until_ready(out)

    # Pure-JAX reference on the same mixed-precision path (bf16 matmul
    # operands, f32 accumulation; eval-mode dropout == identity).
    x2 = x.reshape(-1, E).astype(jnp.bfloat16)
    h_ref = jnp.dot(x2, w1.T.astype(jnp.bfloat16),
                    preferred_element_type=jnp.float32) + b1
    h_ref = jnp.maximum(h_ref, 0.0)
    y_ref = jnp.dot(h_ref.astype(jnp.bfloat16), w2.T.astype(jnp.bfloat16),
                    preferred_element_type=jnp.float32) + b2
    ref = y_ref.astype(x.dtype).reshape(B, T, E)

    assert out.shape == (B, T, E)
    assert jnp.allclose(out, ref, atol=1e-2, rtol=1e-2), (
        float(jnp.max(jnp.abs(out - ref))))

    print("KERNEL_OK")
</pallas_src>

<mosaic_0001>
module attributes {stable_mosaic.version = 11 : i64} {
  func.func @_ffn_resident_kernel(%arg0: i32, %arg1: memref<8x128xbf16, #tpu.memory_space<vmem>>, %arg2: memref<128x128xbf16, #tpu.memory_space<vmem>>, %arg3: memref<1x128xf32, #tpu.memory_space<vmem>>, %arg4: memref<128x128xbf16, #tpu.memory_space<vmem>>, %arg5: memref<1x128xf32, #tpu.memory_space<vmem>>, %arg6: memref<8x128xf32, #tpu.memory_space<vmem>>) attributes {dimension_semantics = [#tpu.dimension_semantics<parallel>], iteration_bounds = array<i64: 2>, scalar_prefetch = 0 : i64, scratch_operands = 0 : i64, tpu.core_type = #tpu.core_type<tc>, window_params = [{transform_indices = @transform_0, window_bounds = array<i64: 8, 128>}, {pipeline_mode = #tpu.pipeline_mode<synchronous>, transform_indices = @transform_1, window_bounds = array<i64: 128, 128>}, {pipeline_mode = #tpu.pipeline_mode<synchronous>, transform_indices = @transform_2, window_bounds = array<i64: 1, 128>}, {pipeline_mode = #tpu.pipeline_mode<synchronous>, transform_indices = @transform_3, window_bounds = array<i64: 128, 128>}, {pipeline_mode = #tpu.pipeline_mode<synchronous>, transform_indices = @transform_4, window_bounds = array<i64: 1, 128>}, {transform_indices = @transform_5, window_bounds = array<i64: 8, 128>}]} {
    %c0 = arith.constant 0 : index
    %c0_0 = arith.constant 0 : index
    %0 = vector.load %arg1[%c0, %c0_0] : memref<8x128xbf16, #tpu.memory_space<vmem>>, vector<8x128xbf16>
    %c0_1 = arith.constant 0 : index
    %c0_2 = arith.constant 0 : index
    %1 = vector.load %arg2[%c0_1, %c0_2] : memref<128x128xbf16, #tpu.memory_space<vmem>>, vector<128x128xbf16>
    %cst = arith.constant dense<0.000000e+00> : vector<8x128xf32>
    %2 = tpu.matmul %0, %1, %cst {dimension_numbers = #tpu.dot_dimension_numbers<[1], [0], [0], [1], [0, 0, 1, 1], [], []>} : vector<8x128xbf16>, vector<128x128xbf16>, vector<8x128xf32> -> vector<8x128xf32>
    %c0_3 = arith.constant 0 : index
    %c0_4 = arith.constant 0 : index
    %3 = vector.load %arg3[%c0_3, %c0_4] : memref<1x128xf32, #tpu.memory_space<vmem>>, vector<1x128xf32>
    %4 = vector.broadcast %3 : vector<1x128xf32> to vector<8x128xf32>
    %5 = arith.addf %2, %4 : vector<8x128xf32>
    %cst_5 = arith.constant 0.000000e+00 : f32
    %6 = vector.broadcast %cst_5 : f32 to vector<8x128xf32>
    %7 = arith.maximumf %5, %6 : vector<8x128xf32>
    %8 = arith.truncf %7 : vector<8x128xf32> to vector<8x128xbf16>
    %c0_6 = arith.constant 0 : index
    %c0_7 = arith.constant 0 : index
    %9 = vector.load %arg4[%c0_6, %c0_7] : memref<128x128xbf16, #tpu.memory_space<vmem>>, vector<128x128xbf16>
    %cst_8 = arith.constant dense<0.000000e+00> : vector<8x128xf32>
    %10 = tpu.matmul %8, %9, %cst_8 {dimension_numbers = #tpu.dot_dimension_numbers<[1], [0], [0], [1], [0, 0, 1, 1], [], []>} : vector<8x128xbf16>, vector<128x128xbf16>, vector<8x128xf32> -> vector<8x128xf32>
    %c0_9 = arith.constant 0 : index
    %c0_10 = arith.constant 0 : index
    %11 = vector.load %arg5[%c0_9, %c0_10] : memref<1x128xf32, #tpu.memory_space<vmem>>, vector<1x128xf32>
    %12 = vector.broadcast %11 : vector<1x128xf32> to vector<8x128xf32>
    %13 = arith.addf %10, %12 : vector<8x128xf32>
    %c0_11 = arith.constant 0 : index
    %c0_12 = arith.constant 0 : index
    %14 = vector.load %arg6[%c0_11, %c0_12] : memref<8x128xf32, #tpu.memory_space<vmem>>, vector<8x128xf32>
    tpu.vector_store %arg6[%c0_11, %c0_12], %13 {strides = array<i32>} : memref<8x128xf32, #tpu.memory_space<vmem>>, vector<8x128xf32>,
    return
  }
  func.func @transform_0(%arg0: i32) -> (i32, i32) {
    %c0_i32 = arith.constant 0 : i32
    %c0_i32_0 = arith.constant 0 : i32
    return %arg0, %c0_i32 : i32, i32
  }
  func.func @transform_1(%arg0: i32) -> (i32, i32) {
    %c0_i32 = arith.constant 0 : i32
    %c0_i32_0 = arith.constant 0 : i32
    %c0_i32_1 = arith.constant 0 : i32
    return %c0_i32, %c0_i32_0 : i32, i32
  }
  func.func @transform_2(%arg0: i32) -> (i32, i32) {
    %c0_i32 = arith.constant 0 : i32
    %c0_i32_0 = arith.constant 0 : i32
    %c0_i32_1 = arith.constant 0 : i32
    return %c0_i32, %c0_i32_0 : i32, i32
  }
  func.func @transform_3(%arg0: i32) -> (i32, i32) {
    %c0_i32 = arith.constant 0 : i32
    %c0_i32_0 = arith.constant 0 : i32
    %c0_i32_1 = arith.constant 0 : i32
    return %c0_i32, %c0_i32_0 : i32, i32
  }
  func.func @transform_4(%arg0: i32) -> (i32, i32) {
    %c0_i32 = arith.constant 0 : i32
    %c0_i32_0 = arith.constant 0 : i32
    %c0_i32_1 = arith.constant 0 : i32
    return %c0_i32, %c0_i32_0 : i32, i32
  }
  func.func @transform_5(%arg0: i32) -> (i32, i32) {
    %c0_i32 = arith.constant 0 : i32
    %c0_i32_0 = arith.constant 0 : i32
    return %arg0, %c0_i32 : i32, i32
  }
}

</mosaic_0001>

<bundles_post_ra>
// kernel: feed_forward.1
= control target key start
LH: loop header
LB: loop body
LE: loop exit
PB: predicated region body
PF: predicated region fallthrough
CT: control target
= control target key end

     0   :  { %10 = vsyncpa [#allocation3], 0  ;;  %s901_s0 = inlined_call_operand.vmem [shape: bf16[16,128], index: 0, kind: input, shape index: {}]   ;;  %s902_s1 = inlined_call_operand.hbm [shape: bf16[128,128], index: 1, kind: input, shape index: {}]   ;;  %s903_s2 = inlined_call_operand.vmem [shape: f32[1,128], index: 2, kind: input, shape index: {}]   ;;  %s904_s3 = inlined_call_operand.hbm [shape: bf16[128,128], index: 3, kind: input, shape index: {}]   ;;  %s905_s4 = inlined_call_operand.vmem [shape: f32[1,128], index: 4, kind: input, shape index: {}]   ;;  %s906_s5 = inlined_call_operand.vmem [shape: f32[16,128], index: 5, kind: output, shape index: {}]  }
   0x1   :  { %11 = vsyncpa [#allocation5], 0  ;;  %s798_s18 = smov 0  }
   0x2 LB: > { %s804_s19 = sadd.s32 4294967295, %s760_s18   ;;  %p554_p0 = scmp.ge.s32.totalorder %s760_s18, 1  ;;  %s760_s18 = sphi %s798_s18, %s17_s18  }
   0x3   : > { %p158_p1 = scmp.lt.s32.totalorder %s760_s18, 3  ;;  %s762_s20 = smov [#allocation2]  }
   0x4   : > { %s170_s21 = sshll.u32 %s762_s20, 4  ;;  %p907_p3 = scmp.eq.s32.totalorder %s804_s19, 0  ;;  %s171_s21 = int_to_ptr.vmem [resolvable:$true] %s170_s21 }
   0x5   : > { %p808_p2 = pnand %p554_p0, %p158_p1  ;;  %s763_s23 = smov [#allocation4]  }
   0x6   : > { %s186_s24 = sshll.u32 %s763_s23, 4  ;;  %s690_s28 = scalar_lea.hbm %s902_s1, 1024  ;;  %s821_s24 = int_to_ptr.vmem [resolvable:$true] %s186_s24 }
   0x7   : > { %s909_s22 = scalar_select %p808_p2, 1, 0 }
   0x8   : > { %p649_p4 = pneg %p808_p2  ;;  %p691_p6 = scmp.ne.s32.totalorder %s902_s1, %s690_s28 }
   0x9   : > { %p697_p10 = scmp.lt.u32.totalorder %s690_s28, %s902_s1 }
   0xa   : > { %p817_p5 = pnand %p907_p3, %p649_p4 }
   0xc   : > { %p692_p7 = pneg %p817_p5 }
   0xe   : > { %p693_p8 = pnand %p692_p7, %p691_p6 }
  0x10   : > { %p694_p9 = pneg %p693_p8 }
  0x12   : > { %p699_p11 = pnand %p697_p10, %p694_p9 }
  0x14   : > { %702 = shalt.err (!%p699_p11)
}
  0x15   : > { %s703_s8 = scalar_lea.vmem %s171_s21, 1024  ;;  %p711_p1 = scmp.lt.s32.totalorder %s171_s21, %s171_s21 }
  0x16   : > { %p704_p12 = scmp.ne.s32.totalorder %s171_s21, %s703_s8  ;;  %p712_p4 = scmp.lt.s32.totalorder %s703_s8, %s703_s8 }
  0x18   : > { %p706_p13 = pnand %p704_p12, %p692_p7  ;;  %p713_p3 = por %p712_p4, %p711_p1 }
  0x1a   : > { %p707_p0 = pneg %p706_p13 }
  0x1c   : > { %p714_p2 = pnand %p713_p3, %p707_p0 }
  0x1e   : > { %717 = shalt.err (!%p714_p2)
}
  0x1f   : > { %s764_s9 = smov 64   ;;  %s765_s10 = smov 4  }
  0x20   : > { %652 = dma.hbm_to_vmem [thread:$0]  (!%p817_p5), %s902_s1, 1024, %s171_s21, [#allocation3], %s764_s9, %s764_s9, %s765_s10  }
  0x21   : > { %s718_s15 = scalar_lea.hbm %s904_s3, 1024 }
  0x22   : > { %p719_p6 = scmp.ne.s32.totalorder %s904_s3, %s718_s15  ;;  %p725_p8 = scmp.lt.u32.totalorder %s718_s15, %s904_s3 }
  0x24   : > { %p721_p2 = pnand %p719_p6, %p692_p7 }
  0x26   : > { %p722_p3 = pneg %p721_p2 }
  0x28   : > { %p727_p9 = pnand %p725_p8, %p722_p3 }
  0x2a   : > { %730 = shalt.err (!%p727_p9)
}
  0x2b   : > { %s731_s21 = scalar_lea.vmem %s821_s24, 1024  ;;  %p739_p13 = scmp.lt.s32.totalorder %s821_s24, %s821_s24 }
  0x2c   : > { %p732_p10 = scmp.ne.s32.totalorder %s821_s24, %s731_s21  ;;  %p740_p0 = scmp.lt.s32.totalorder %s731_s21, %s731_s21 }
  0x2e   : > { %p734_p11 = pnand %p732_p10, %p692_p7  ;;  %p741_p1 = por %p740_p0, %p739_p13 }
  0x30   : > { %p735_p12 = pneg %p734_p11 }
  0x32   : > { %p742_p4 = pnand %p741_p1, %p735_p12 }
  0x34   : > { %745 = shalt.err (!%p742_p4)
}
  0x35   : > { %655 = dma.hbm_to_vmem [thread:$0]  (!%p817_p5), %s904_s3, 1024, %s821_s24, [#allocation5], %s764_s9, %s764_s9, %s765_s10  }
  0x36   : > { %p911_p6 = scmp.ne.s32.totalorder %s909_s22, 0 }
  0x37   : > { %p912_p2 = scmp.eq.s32.totalorder (!%p911_p6), %s804_s19, 0 }
  0x38   : > { %212 = sbr.rel (%p911_p6) target bundleno = 534 (0x216), region = 40 }
  0x3f   : > { %751 = dma.done.wait (%p912_p2), [#allocation3], 1024   ;;  %p913_p7 = pmov %p912_p2 }
  0x40   : > { %p914_p3 = pmov %p912_p2 }
  0x41   : > { %753 = vsyncadd (%p913_p7), [#allocation3], 4294966272 }
  0x42   : > { %755 = dma.done.wait (%p914_p3), [#allocation5], 1024   ;;  %p915_p8 = pmov %p912_p2 }
  0x43   : > { %v766_v0 = vmov 0.0   ;;  %vm767_vm0 = vmmov 0   ;;  %v674_v1 = vld [vmem:[#allocation2] sm:$0xff]   ;;  %v675_v2 = vld [vmem:[#allocation2 + $0x8] sm:$0xff]   ;;  %v676_v3 = vld [vmem:[#allocation2 + $0x10] sm:$0xff]   ;;  %p242_p5 = scmp.lt.s32.totalorder %s804_s19, 1 }
  0x44   : > { %757 = vsyncadd (%p915_p8), [#allocation5], 4294966272  ;;  %601 = vmatprep.subr.bf16.mxu0 %v766_v0  ;;  %617 = vmatprep.mubr.msk.bf16.mxu0 %vm767_vm0, %v766_v0  ;;  %v682_v4 = vld [vmem:[#allocation4] sm:$0xff]   ;;  %v677_v5 = vld [vmem:[#allocation2 + $0x18] sm:$0xff]  }
  0x45   : > { %621 = vmatprep.subr.bf16.mxu1 %v766_v0  ;;  %637 = vmatprep.mubr.msk.bf16.mxu1 %vm767_vm0, %v766_v0  ;;  %v683_v6 = vld [vmem:[#allocation4 + $0x8] sm:$0xff]   ;;  %v678_v7 = vld [vmem:[#allocation2 + $0x20] sm:$0xff]   ;;  %v684_v8 = vld [vmem:[#allocation4 + $0x10] sm:$0xff]   ;;  %s917_s19 = smov (!%p242_p5, %s804_s19), 1 }
  0x46   : > { %602 = vmatpush3.bf16.msra.mxu0 %v674_v1  ;;  %622 = vmatpush3.bf16.msra.mxu1 %v682_v4  ;;  %v679_v9 = vld [vmem:[#allocation2 + $0x28] sm:$0xff]   ;;  %v685_v10 = vld [vmem:[#allocation4 + $0x18] sm:$0xff]   ;;  %v680_v11 = vld [vmem:[#allocation2 + $0x30] sm:$0xff]   ;;  %s561_s22 = sshll.u32 %s917_s19, 2  ;;  %s562_s6 = sshll.u32 %s917_s19, 3 }
  0x47   : > { %603 = vmatprep.subr.bf16.mxu0 %v766_v0  ;;  %623 = vmatprep.subr.bf16.mxu1 %v766_v0  ;;  %v686_v12 = vld [vmem:[#allocation4 + $0x20] sm:$0xff]   ;;  %v681_v13 = vld [vmem:[#allocation2 + $0x38] sm:$0xff]   ;;  %s245_s28 = scalar_lea.vmem %s901_s0, %s561_s22  ;;  %v687_v14 = vld [vmem:[#allocation4 + $0x28] sm:$0xff]   ;;  %s249_s11 = scalar_lea.vmem %s906_s5, %s562_s6 }
  0x48   : > { %v251_v15 = vld [vmem:[%s245_s28] sm:$0xf]  ;;  %v688_v16 = vld [vmem:[#allocation4 + $0x30] sm:$0xff]   ;;  %v689_v17 = vld [vmem:[#allocation4 + $0x38] sm:$0xff]  }
  0x49   : > { %v563_v18 = vld [vmem:[%s903_s2] ss:$0 sm:$0xff] }
  0x4a   : > { %604 = vmatpush3.bf16.msra.mxu0 %v675_v2  ;;  %624 = vmatpush3.bf16.msra.mxu1 %v683_v6  ;;  %v572_v26 = vld [vmem:[%s905_s4] ss:$0 sm:$0xff] }
  0x4b   : > { %605 = vmatprep.subr.bf16.mxu0 %v766_v0  ;;  %625 = vmatprep.subr.bf16.mxu1 %v766_v0 }
  0x4e   : > { %606 = vmatpush3.bf16.msra.mxu0 %v676_v3  ;;  %626 = vmatpush3.bf16.msra.mxu1 %v684_v8 }
  0x4f   : > { %607 = vmatprep.subr.bf16.mxu0 %v766_v0  ;;  %627 = vmatprep.subr.bf16.mxu1 %v766_v0 }
  0x52   : > { %608 = vmatpush3.bf16.msra.mxu0 %v677_v5  ;;  %628 = vmatpush3.bf16.msra.mxu1 %v685_v10 }
  0x53   : > { %609 = vmatprep.subr.bf16.mxu0 %v766_v0  ;;  %629 = vmatprep.subr.bf16.mxu1 %v766_v0 }
  0x56   : > { %610 = vmatpush3.bf16.msra.mxu0 %v678_v7  ;;  %630 = vmatpush3.bf16.msra.mxu1 %v686_v12 }
  0x57   : > { %611 = vmatprep.subr.bf16.mxu0 %v766_v0  ;;  %631 = vmatprep.subr.bf16.mxu1 %v766_v0 }
  0x5a   : > { %612 = vmatpush3.bf16.msra.mxu0 %v679_v9  ;;  %632 = vmatpush3.bf16.msra.mxu1 %v687_v14 }
  0x5b   : > { %613 = vmatprep.subr.bf16.mxu0 %v766_v0  ;;  %633 = vmatprep.subr.bf16.mxu1 %v766_v0 }
  0x5e   : > { %614 = vmatpush3.bf16.msra.mxu0 %v680_v11  ;;  %634 = vmatpush3.bf16.msra.mxu1 %v688_v16 }
  0x5f   : > { %615 = vmatprep.subr.bf16.mxu0 %v766_v0  ;;  %635 = vmatprep.subr.bf16.mxu1 %v766_v0 }
  0x62   : > { %616 = vmatpush3.bf16.msra.mxu0 %v681_v13  ;;  %636 = vmatpush3.bf16.msra.mxu1 %v689_v17 }
  0x65   : > { %618 = vmatmul.mubr.bf16.vlgmr.msra.gmra.mrb[0].mxu0 %v251_v15 }
 0x138   : > { %v357_v19 = vpop.f32.mrb[0].mxu0 }
 0x139   : > { %v358_v20 = vadd.f32 %v563_v18, %v357_v19  ;;  %v619_v21 = vpop.f32.mrb[1].mxu0 }
 0x13a   : > { %v360_v22 = vpop.f32.mrb[2].mxu0 }
 0x13b   : > { %v363_v23 = vmax.f32 %v358_v20, 0.0  ;;  %v620_v24 = vpop.f32.mrb[3].mxu0 }
 0x13d   : > { %v364_v25 = vpack.c.bf16 %v363_v23, %v363_v23 }
 0x13f   : > { %638 = vmatmul.mubr.bf16.vlgmr.msra.gmra.mrb[0].mxu1 %v364_v25 }
 0x212   : > { %v470_v27 = vpop.f32.mrb[0].mxu1 }
 0x213   : > { %v471_v28 = vadd.f32 %v572_v26, %v470_v27  ;;  %v639_v29 = vpop.f32.mrb[1].mxu1 }
 0x214   : > { %v473_v30 = vpop.f32.mrb[2].mxu1 }
 0x215   : > { %476 = vst [vmem:[%s249_s11] sm:$0xff] %v471_v28  ;;  %v640_v31 = vpop.f32.mrb[3].mxu1 }
 0x216 PF: > { %s17_s18 = sadd.s32 1, %s760_s18  }
 0x217   : > { %p14_p9 = scmp.ge.s32.totalorder %s17_s18, 4  }
 0x219   :  { %16 = sbr.rel (!%p14_p9) target bundleno = 2 (0x2), region = 79 }
 0x220   :  { %496 = vsyncpa [#allocation3], 1 }
 0x221   :  { %498 = vsyncpa [#allocation3 + $0x1], 1 }
 0x222   :  { %499 = vsyncpa [#allocation5], 1 }

</bundles_post_ra>
